<compile_context>
chip_gen: v7x
topology: tpu7x:2x2x1
jax: 0.10.0
libtpu: 0.0.40
codegen_flags: <defaults>
</compile_context>

<pallas_src>
import jax
import jax.numpy as jnp
from jax.experimental import pallas as pl
from jax.experimental.pallas import tpu as pltpu


def _pgen_kernel(emb_ref, hid_ref, enc_ref, we_ref, wh_ref, wc_ref, b_ref, out_ref):
    # emb_ref: (TB, E), hid_ref: (TB, H), enc_ref: (TB, C)
    # we/wh/wc: (1, E)/(1, H)/(1, C) lane-dense weight rows, b_ref: (1, 1) in SMEM.
    # Partial dot products: VPU multiply + one cross-lane reduce per stream,
    # all accumulated in f32 regardless of the input dtype.
    acc = jnp.sum(
        emb_ref[...].astype(jnp.float32) * we_ref[...].astype(jnp.float32),
        axis=-1, keepdims=True)
    acc = acc + jnp.sum(
        hid_ref[...].astype(jnp.float32) * wh_ref[...].astype(jnp.float32),
        axis=-1, keepdims=True)
    acc = acc + jnp.sum(
        enc_ref[...].astype(jnp.float32) * wc_ref[...].astype(jnp.float32),
        axis=-1, keepdims=True)
    acc = acc + b_ref[0, 0]                       # scalar-broadcast bias add
    out_ref[...] = jax.nn.sigmoid(acc).astype(out_ref.dtype)


def _round_up(x, m):
    return ((x + m - 1) // m) * m


def _choose_tb(B, tb):
    """Batch-tile: big enough to amortize per-step overhead, small enough that
    large B yields >= 8 grid steps (keeps both v7x TensorCores busy)."""
    if B <= 8:
        return B
    target = max(512, pl.cdiv(B, 8))
    TB = min(tb, target, B)
    if TB == B:
        return TB
    return max(8, (TB // 8) * 8)


def pgen_layer(emb, hid, enc, weight, bias, *, tb=4096):
    """emb: (B, E), hid: (B, H), enc: (B, C)  (f32 or bf16).
    weight: (1, E+H+C)  (PyTorch nn.Linear layout), bias: (1,).
    Returns sigmoid(cat([emb,hid,enc],1) @ weight.T + bias) as (B, 1) float32."""
    B, E = emb.shape
    H = hid.shape[1]
    C = enc.shape[1]
    K = E + H + C
    assert weight.shape == (1, K), weight.shape

    # Split the weight row to match the three input streams (tiny one-time slices;
    # avoids materializing a concatenated (B, K) activation slab in HBM).
    w = weight.reshape(1, K)
    we = w[:, :E]
    wh = w[:, E:E + H]
    wc = w[:, E + H:]
    b = bias.reshape(1, 1).astype(jnp.float32)   # SMEM scalar

    TB = _choose_tb(B, tb)
    grid = (pl.cdiv(B, TB),)

    # Explicit VMEM budget (double-buffered streams, lane-padded, f32 upper bound).
    vmem_bytes = 0
    for d in (E, H, C):
        vmem_bytes += 2 * TB * _round_up(d, 128) * 4     # input streams
    vmem_bytes += 2 * _round_up(TB, 8) * 128 * 4          # (TB, 1) output, lane-padded
    vmem_bytes += 3 * 2 * 8 * 128 * 4                     # resident weight rows
    vmem_limit = int(min(48 * 1024 * 1024, max(16 * 1024 * 1024, 2 * vmem_bytes)))

    in_bytes = (emb.size * emb.dtype.itemsize
                + hid.size * hid.dtype.itemsize
                + enc.size * enc.dtype.itemsize
                + weight.size * weight.dtype.itemsize)
    cost = pl.CostEstimate(
        flops=2 * B * K + 2 * B,
        transcendentals=B,
        bytes_accessed=in_bytes + B * 4,
    )

    out = pl.pallas_call(
        _pgen_kernel,
        out_shape=jax.ShapeDtypeStruct((B, 1), jnp.float32),
        grid_spec=pltpu.PrefetchScalarGridSpec(
            num_scalar_prefetch=0,
            grid=grid,
            in_specs=[
                pl.BlockSpec((TB, E), lambda i: (i, 0)),              # emb stream
                pl.BlockSpec((TB, H), lambda i: (i, 0)),              # hid stream
                pl.BlockSpec((TB, C), lambda i: (i, 0)),              # enc stream
                pl.BlockSpec((1, E), lambda i: (0, 0)),               # weight (emb part)
                pl.BlockSpec((1, H), lambda i: (0, 0)),               # weight (hid part)
                pl.BlockSpec((1, C), lambda i: (0, 0)),               # weight (enc part)
                pl.BlockSpec(memory_space=pltpu.MemorySpace.SMEM),    # bias scalar
            ],
            out_specs=pl.BlockSpec((TB, 1), lambda i: (i, 0)),
        ),
        compiler_params=pltpu.CompilerParams(
            dimension_semantics=("parallel",),
            vmem_limit_bytes=vmem_limit,
        ),
        cost_estimate=cost,
    )(emb, hid, enc, we, wh, wc, b)
    return out


def _reference(emb, hid, enc, weight, bias):
    x = jnp.concatenate([emb.astype(jnp.float32),
                         hid.astype(jnp.float32),
                         enc.astype(jnp.float32)], axis=1)
    return jax.nn.sigmoid(x @ weight.astype(jnp.float32).T + bias.astype(jnp.float32))


if __name__ == "__main__":
    # Small shapes consistent with the module (non-128-multiple widths on purpose).
    B, E, H, C = 8, 32, 32, 64

    key = jax.random.PRNGKey(0)
    k_emb, k_hid, k_enc, k_w, k_b = jax.random.split(key, 5)

    emb = jax.random.normal(k_emb, (B, E), dtype=jnp.float32)
    hid = jax.random.normal(k_hid, (B, H), dtype=jnp.float32)
    enc = jax.random.normal(k_enc, (B, C), dtype=jnp.float32)

    # Deterministic parameter init (matches nn.Linear uniform(-1/sqrt(in), 1/sqrt(in))).
    fan_in = E + H + C
    bound = 1.0 / jnp.sqrt(fan_in)
    weight = jax.random.uniform(k_w, (1, fan_in), minval=-bound, maxval=bound,
                                dtype=jnp.float32)
    bias = jax.random.uniform(k_b, (1,), minval=-bound, maxval=bound,
                              dtype=jnp.float32)

    out = pgen_layer(emb, hid, enc, weight, bias)
    jax.block_until_ready(out)

    ref = _reference(emb, hid, enc, weight, bias)
    assert out.shape == (B, 1), out.shape
    assert jnp.allclose(out, ref, atol=1e-5, rtol=1e-5), (
        float(jnp.max(jnp.abs(out - ref))))

    print("KERNEL_OK")
</pallas_src>

<mosaic_0001>
module attributes {stable_mosaic.version = 11 : i64} {
  func.func @_pgen_kernel(%arg0: i32, %arg1: memref<8x32xf32, #tpu.memory_space<vmem>>, %arg2: memref<8x32xf32, #tpu.memory_space<vmem>>, %arg3: memref<8x64xf32, #tpu.memory_space<vmem>>, %arg4: memref<1x32xf32, #tpu.memory_space<vmem>>, %arg5: memref<1x32xf32, #tpu.memory_space<vmem>>, %arg6: memref<1x64xf32, #tpu.memory_space<vmem>>, %arg7: memref<1x1xf32, #tpu.memory_space<smem>>, %arg8: memref<8x1xf32, #tpu.memory_space<vmem>>) attributes {dimension_semantics = [#tpu.dimension_semantics<parallel>], iteration_bounds = array<i64: 1>, scalar_prefetch = 0 : i64, scratch_operands = 0 : i64, tpu.core_type = #tpu.core_type<tc>, window_params = [{transform_indices = @transform_0, window_bounds = array<i64: 8, 32>}, {transform_indices = @transform_1, window_bounds = array<i64: 8, 32>}, {transform_indices = @transform_2, window_bounds = array<i64: 8, 64>}, {pipeline_mode = #tpu.pipeline_mode<synchronous>, transform_indices = @transform_3, window_bounds = array<i64: 1, 32>}, {pipeline_mode = #tpu.pipeline_mode<synchronous>, transform_indices = @transform_4, window_bounds = array<i64: 1, 32>}, {pipeline_mode = #tpu.pipeline_mode<synchronous>, transform_indices = @transform_5, window_bounds = array<i64: 1, 64>}, {transform_indices = @transform_6, window_bounds = array<i64: 1, 1>}, {transform_indices = @transform_7, window_bounds = array<i64: 8, 1>}]} {
    %c0 = arith.constant 0 : index
    %c0_0 = arith.constant 0 : index
    %0 = vector.load %arg1[%c0, %c0_0] : memref<8x32xf32, #tpu.memory_space<vmem>>, vector<8x32xf32>
    %c0_1 = arith.constant 0 : index
    %c0_2 = arith.constant 0 : index
    %1 = vector.load %arg4[%c0_1, %c0_2] : memref<1x32xf32, #tpu.memory_space<vmem>>, vector<1x32xf32>
    %2 = vector.broadcast %1 : vector<1x32xf32> to vector<8x32xf32>
    %3 = arith.mulf %0, %2 : vector<8x32xf32>
    %cst = arith.constant dense<0.000000e+00> : vector<8xf32>
    %4 = vector.multi_reduction <add>, %3, %cst [1] : vector<8x32xf32> to vector<8xf32>
    %5 = vector.shape_cast %4 : vector<8xf32> to vector<8x1xf32>
    %c0_3 = arith.constant 0 : index
    %c0_4 = arith.constant 0 : index
    %6 = vector.load %arg2[%c0_3, %c0_4] : memref<8x32xf32, #tpu.memory_space<vmem>>, vector<8x32xf32>
    %c0_5 = arith.constant 0 : index
    %c0_6 = arith.constant 0 : index
    %7 = vector.load %arg5[%c0_5, %c0_6] : memref<1x32xf32, #tpu.memory_space<vmem>>, vector<1x32xf32>
    %8 = vector.broadcast %7 : vector<1x32xf32> to vector<8x32xf32>
    %9 = arith.mulf %6, %8 : vector<8x32xf32>
    %cst_7 = arith.constant dense<0.000000e+00> : vector<8xf32>
    %10 = vector.multi_reduction <add>, %9, %cst_7 [1] : vector<8x32xf32> to vector<8xf32>
    %11 = vector.shape_cast %10 : vector<8xf32> to vector<8x1xf32>
    %12 = arith.addf %5, %11 : vector<8x1xf32>
    %c0_8 = arith.constant 0 : index
    %c0_9 = arith.constant 0 : index
    %13 = vector.load %arg3[%c0_8, %c0_9] : memref<8x64xf32, #tpu.memory_space<vmem>>, vector<8x64xf32>
    %c0_10 = arith.constant 0 : index
    %c0_11 = arith.constant 0 : index
    %14 = vector.load %arg6[%c0_10, %c0_11] : memref<1x64xf32, #tpu.memory_space<vmem>>, vector<1x64xf32>
    %15 = vector.broadcast %14 : vector<1x64xf32> to vector<8x64xf32>
    %16 = arith.mulf %13, %15 : vector<8x64xf32>
    %cst_12 = arith.constant dense<0.000000e+00> : vector<8xf32>
    %17 = vector.multi_reduction <add>, %16, %cst_12 [1] : vector<8x64xf32> to vector<8xf32>
    %18 = vector.shape_cast %17 : vector<8xf32> to vector<8x1xf32>
    %19 = arith.addf %12, %18 : vector<8x1xf32>
    %c0_13 = arith.constant 0 : index
    %c0_14 = arith.constant 0 : index
    %20 = memref.load %arg7[%c0_13, %c0_14] : memref<1x1xf32, #tpu.memory_space<smem>>
    %21 = vector.broadcast %20 : f32 to vector<8x1xf32>
    %22 = arith.addf %19, %21 : vector<8x1xf32>
    %23 = arith.negf %22 : vector<8x1xf32>
    %24 = math.exp %23 : vector<8x1xf32>
    %cst_15 = arith.constant 1.000000e+00 : f32
    %25 = vector.broadcast %cst_15 : f32 to vector<8x1xf32>
    %26 = arith.addf %25, %24 : vector<8x1xf32>
    %27 = arith.divf %25, %26 : vector<8x1xf32>
    %c0_16 = arith.constant 0 : index
    %c0_17 = arith.constant 0 : index
    %28 = vector.load %arg8[%c0_16, %c0_17] : memref<8x1xf32, #tpu.memory_space<vmem>>, vector<8x1xf32>
    tpu.vector_store %arg8[%c0_16, %c0_17], %27 {strides = array<i32>} : memref<8x1xf32, #tpu.memory_space<vmem>>, vector<8x1xf32>,
    return
  }
  func.func @transform_0(%arg0: i32) -> (i32, i32) {
    %c0_i32 = arith.constant 0 : i32
    %c0_i32_0 = arith.constant 0 : i32
    return %arg0, %c0_i32 : i32, i32
  }
  func.func @transform_1(%arg0: i32) -> (i32, i32) {
    %c0_i32 = arith.constant 0 : i32
    %c0_i32_0 = arith.constant 0 : i32
    return %arg0, %c0_i32 : i32, i32
  }
  func.func @transform_2(%arg0: i32) -> (i32, i32) {
    %c0_i32 = arith.constant 0 : i32
    %c0_i32_0 = arith.constant 0 : i32
    return %arg0, %c0_i32 : i32, i32
  }
  func.func @transform_3(%arg0: i32) -> (i32, i32) {
    %c0_i32 = arith.constant 0 : i32
    %c0_i32_0 = arith.constant 0 : i32
    %c0_i32_1 = arith.constant 0 : i32
    return %c0_i32, %c0_i32_0 : i32, i32
  }
  func.func @transform_4(%arg0: i32) -> (i32, i32) {
    %c0_i32 = arith.constant 0 : i32
    %c0_i32_0 = arith.constant 0 : i32
    %c0_i32_1 = arith.constant 0 : i32
    return %c0_i32, %c0_i32_0 : i32, i32
  }
  func.func @transform_5(%arg0: i32) -> (i32, i32) {
    %c0_i32 = arith.constant 0 : i32
    %c0_i32_0 = arith.constant 0 : i32
    %c0_i32_1 = arith.constant 0 : i32
    return %c0_i32, %c0_i32_0 : i32, i32
  }
  func.func @transform_6(%arg0: i32) -> (i32, i32) {
    %c0_i32 = arith.constant 0 : i32
    %c0_i32_0 = arith.constant 0 : i32
    %c0_i32_1 = arith.constant 0 : i32
    return %c0_i32, %c0_i32_0 : i32, i32
  }
  func.func @transform_7(%arg0: i32) -> (i32, i32) {
    %c0_i32 = arith.constant 0 : i32
    %c0_i32_0 = arith.constant 0 : i32
    return %arg0, %c0_i32 : i32, i32
  }
}

</mosaic_0001>

<bundles_post_ra>
// kernel: tpu_custom_call.1
= control target key start
LH: loop header
LB: loop body
LE: loop exit
PB: predicated region body
PF: predicated region fallthrough
CT: control target
= control target key end

     0   :  { %13 = vsyncpa [#allocation4], 0  ;;  %s250_s0 = inlined_call_operand.hbm [shape: f32[8,32], index: 0, kind: input, shape index: {}]   ;;  %s251_s1 = inlined_call_operand.hbm [shape: f32[8,32], index: 1, kind: input, shape index: {}]   ;;  %s252_s2 = inlined_call_operand.vmem [shape: f32[8,64], index: 2, kind: input, shape index: {}]   ;;  %s253_s3 = inlined_call_operand.vmem [shape: f32[1,32], index: 3, kind: input, shape index: {}]   ;;  %s254_s4 = inlined_call_operand.vmem [shape: f32[1,32], index: 4, kind: input, shape index: {}]   ;;  %s255_s5 = inlined_call_operand.vmem [shape: f32[1,64], index: 5, kind: input, shape index: {}]   ;;  %s256_s6 = inlined_call_operand.<no memory space> [shape: f32[1,1], index: 6, kind: input, shape index: {}]   ;;  %s257_s7 = inlined_call_operand.vmem [shape: f32[8,1], index: 7, kind: output, shape index: {}]  }
   0x1   :  { %14 = vsyncpa [#allocation6], 0  ;;  %s166_s24 = smov [#allocation3]   ;;  %s167_s26 = smov [#allocation5]  }
   0x2   :  { %s21_s25 = sshll.u32 %s166_s24, 4  ;;  %s31_s27 = sshll.u32 %s167_s26, 4  ;;  %s22_s25 = int_to_ptr.vmem [resolvable:$true] %s21_s25  ;;  %s32_s27 = int_to_ptr.vmem [resolvable:$true] %s31_s27 }
   0x3   :  { %s118_s30 = scalar_lea.hbm %s250_s0, 128 }
   0x4   :  { %p119_p0 = scmp.ne.s32.totalorder %s250_s0, %s118_s30  ;;  %p122_p1 = scmp.lt.u32.totalorder %s118_s30, %s250_s0 }
   0x6   :  { %p124_p2 = pnand %p122_p1, %p119_p0 }
   0x8   :  { %127 = shalt.err (!%p124_p2)
}
   0x9   :  { %s128_s12 = scalar_lea.vmem %s22_s25, 128  ;;  %p133_p4 = scmp.lt.s32.totalorder %s22_s25, %s22_s25 }
   0xa   :  { %p129_p3 = scmp.ne.s32.totalorder %s22_s25, %s128_s12  ;;  %p134_p5 = scmp.lt.s32.totalorder %s128_s12, %s128_s12 }
   0xc   :  { %p135_p6 = por %p134_p5, %p133_p4 }
   0xe   :  { %p136_p7 = pnand %p135_p6, %p129_p3 }
  0x10   :  { %139 = shalt.err (!%p136_p7)
}
  0x11   :  { %24 = dma.hbm_to_vmem [thread:$0]  %s250_s0, 128, %s22_s25, [#allocation4]  }
  0x12   :  { %s140_s17 = scalar_lea.hbm %s251_s1, 128 }
  0x13   :  { %p141_p8 = scmp.ne.s32.totalorder %s251_s1, %s140_s17  ;;  %p144_p9 = scmp.lt.u32.totalorder %s140_s17, %s251_s1 }
  0x15   :  { %p146_p10 = pnand %p144_p9, %p141_p8 }
  0x17   :  { %149 = shalt.err (!%p146_p10)
}
  0x18   :  { %s150_s22 = scalar_lea.vmem %s32_s27, 128  ;;  %p155_p12 = scmp.lt.s32.totalorder %s32_s27, %s32_s27 }
  0x19   :  { %p151_p11 = scmp.ne.s32.totalorder %s32_s27, %s150_s22  ;;  %p156_p13 = scmp.lt.s32.totalorder %s150_s22, %s150_s22 }
  0x1b   :  { %p157_p0 = por %p156_p13, %p155_p12 }
  0x1d   :  { %p158_p1 = pnand %p157_p0, %p151_p11 }
  0x1f   :  { %161 = shalt.err (!%p158_p1)
}
  0x20   :  { %34 = dma.hbm_to_vmem [thread:$0]  %s251_s1, 128, %s32_s27, [#allocation6]  }
  0x21   :  { %162 = dma.done.wait [#allocation4], 128  }
  0x22   :  { %163 = vsyncadd [#allocation4], 4294967168 }
  0x23   :  { %164 = dma.done.wait [#allocation6], 128  }
  0x24   :  { %165 = vsyncadd [#allocation6], 4294967168  ;;  %v51_v0 = vld [vmem:[#allocation3] sm:$0xff]  ;;  %vm60_vm0 = vcmask 261120   ;;  %v64_v2 = vld [vmem:[#allocation5] sm:$0xff]  ;;  %vm86_vm1 = vcmask 523264   ;;  %v92_v16 = vstv %s256_s6 }
  0x25   :  { %v108_v1 = vld [vmem:[%s253_s3] ss:$0 sm:$0xff]  ;;  %vm100_vm2 = vcmask 7168  }
  0x26   :  { %v59_v3 = vmul.f32 %v108_v1, %v51_v0  ;;  %v109_v4 = vld [vmem:[%s254_s4] ss:$0 sm:$0xff] }
  0x27   :  { %v77_v5 = vld [vmem:[%s252_s2] sm:$0xff]  ;;  %v72_v7 = vmul.f32 %v109_v4, %v64_v2 }
  0x28   :  { %v110_v6 = vld [vmem:[%s255_s5] ss:$0 sm:$0xff]  ;;  %v61_v9 = vsel %vm60_vm0, %v59_v3, 0.0 }
  0x29   :  { %v85_v8 = vmul.f32 %v110_v6, %v77_v5  ;;  %62 = vadd.xlane.f32.xlu0 %v61_v9  ;;  %v73_v11 = vsel %vm60_vm0, %v72_v7, 0.0 }
  0x2b   :  { %v87_v10 = vsel %vm86_vm1, %v85_v8, 0.0 }
  0x2c   :  { %88 = vadd.xlane.f32.xlu1 %v87_v10 }
  0x2d   :  { %74 = vadd.xlane.f32.xlu0 %v73_v11 }
  0xb6   :  { %v63_v12 = vpop.xlane.xlu0 %62 }
  0xb9   :  { %v89_v14 = vpop.xlane.xlu1 %88 }
  0xba   :  { %v75_v13 = vpop.xlane.xlu0 %74 }
  0xbb   :  { %v76_v15 = vadd.f32 %v75_v13, %v63_v12 }
  0xbd   :  { %v90_v17 = vadd.f32 %v89_v14, %v76_v15 }
  0xbf   :  { %v93_v18 = vadd.f32 %v92_v16, %v90_v17 }
  0xc1   :  { %v111_v19 = vmul.f32 -1.442695, %v93_v18 }
  0xc3   :  { %114 = vpow2.f32 %v111_v19 }
  0xcd   :  { %v115_v20 = vpop.eup %114 }
  0xce   :  { %v97_v21 = vadd.f32 1.0, %v115_v20 }
  0xd0   :  { %116 = vrcp.f32 %v97_v21 }
  0xda   :  { %v117_v22 = vpop.eup %116 }
  0xdb   :  { %101 = vst.msk [vmem:[%s257_s7] sm:$0xff] %vm100_vm2, %v117_v22 }
  0xdc   :  { %106 = vsyncpa [#allocation4], 1 }
  0xdd   :  { %107 = vsyncpa [#allocation6], 1 }

</bundles_post_ra>
